<compile_context>
chip_gen: v7x
topology: tpu7x:2x2x1
jax: 0.10.0
libtpu: 0.0.40
codegen_flags: <defaults>
</compile_context>

<pallas_src>
import functools

import jax
import jax.numpy as jnp
from jax.experimental import pallas as pl
from jax.experimental.pallas import tpu as pltpu


# ------------------------------ helpers --------------------------------------

def _round_up(v, m):
    return (v + m - 1) // m * m


def _sublane(itemsize):
    # Minimal second-to-last tile dim per dtype width.
    return {4: 8, 2: 16, 1: 32}.get(int(itemsize), 8)


@functools.lru_cache(maxsize=1)
def _vmem_capacity():
    """Physical VMEM bytes per core; conservative 64 MiB (v7x-sized) fallback."""
    try:
        info = pltpu.get_tpu_info()
        for name in ("vmem_capacity_bytes", "vmem_size_bytes", "vmem_bytes"):
            cap = int(getattr(info, name, 0) or 0)
            if cap > 0:
                return cap
    except Exception:
        pass
    return 64 << 20


def _choose_tile_rows(rows, lane_pad, itemsize, sublane):
    """Row-tile size: big enough for HBM roofline, small enough for >=2 steps."""
    cap = _vmem_capacity()
    # v5e/v6e have 128 MiB VMEM -> larger per-step budget; v7x only 64 MiB.
    budget = (48 << 20) if cap >= (100 << 20) else (20 << 20)
    per_row = 4 * lane_pad * itemsize              # 2x input + 2x output buffers
    tile = max(budget // per_row, 1)
    if tile < 512:
        # Stretch toward 512-row tiles (~85% of HBM roofline measured) as long
        # as the double-buffered block still leaves half of physical VMEM free.
        stretch = max(budget, cap // 2)
        tile = max(tile, min(512, stretch // per_row))
    tile = min(tile, 2048)
    # Guarantee >= 2 grid steps when rows permit: shards across v7x's two
    # TensorCores and gives the BlockSpec pipeline something to overlap.
    if rows >= 2 * sublane:
        tile = min(tile, _round_up(pl.cdiv(rows, 2), sublane))
    if tile >= rows:
        return rows
    return max((tile // sublane) * sublane, sublane)


def _seg_allreduce(y, seg_width, op):
    """Broadcast `op`-reduction of each aligned `seg_width`-lane segment to all
    of its lanes.  Exact f32 XOR-butterfly: rolls go to the XLU slot, the
    select/op to the VPU, so the packed layout stays lane-dense.  `seg_width`
    is always a power of two here (it divides 128)."""
    lanes = y.shape[-1]
    lane_id = jax.lax.broadcasted_iota(jnp.int32, y.shape, y.ndim - 1)
    s = 1
    while s < seg_width:
        fwd = pltpu.roll(y, lanes - s, axis=y.ndim - 1)   # y[i + s]
        bwd = pltpu.roll(y, s, axis=y.ndim - 1)           # y[i - s]
        partner = jnp.where((lane_id & s) == 0, fwd, bwd)  # y[i XOR s]
        y = op(y, partner)
        s *= 2
    return y


# ------------------------------ kernels ---------------------------------------
# Packed kernels: x block is (tile_rows, 128); each 128-lane row holds 128/C
# complete original rows, weight/bias are the [1, C] params tiled to [1, 128].

def _additive_packed_kernel(x_ref, w_ref, b_ref, o_ref, *, seg_width):
    y = x_ref[...] * jnp.exp(w_ref[...]) + jnp.exp(b_ref[...])
    s = _seg_allreduce(y, seg_width, jnp.add)              # per-original-row sum
    y = y * pl.reciprocal(s, approx=False)                 # exact; approx breaks 1e-5
    o_ref[...] = jnp.log(y + 1e-6).astype(o_ref.dtype)


def _geometric_packed_kernel(x_ref, w_ref, b_ref, o_ref, *, seg_width):
    y = x_ref[...] * jnp.exp(w_ref[...])
    m = _seg_allreduce(y, seg_width, jnp.maximum)          # per-original-row max
    e = jnp.exp(y - m)
    ssum = _seg_allreduce(e, seg_width, jnp.add)
    o_ref[...] = ((y - m - jnp.log(ssum)) + b_ref[...]).astype(o_ref.dtype)


# Fallback row kernels (C >= 128 or C does not pack cleanly into 128 lanes).

def _additive_row_kernel(x_ref, w_ref, b_ref, o_ref):
    y = x_ref[...] * jnp.exp(w_ref[...]) + jnp.exp(b_ref[...])
    s = jnp.sum(y, axis=-1, keepdims=True)
    y = y * pl.reciprocal(s, approx=False)
    o_ref[...] = jnp.log(y + 1e-6).astype(o_ref.dtype)


def _geometric_row_kernel(x_ref, w_ref, b_ref, o_ref):
    y = x_ref[...] * jnp.exp(w_ref[...])
    m = jnp.max(y, axis=-1, keepdims=True)
    lse = m + jnp.log(jnp.sum(jnp.exp(y - m), axis=-1, keepdims=True))
    o_ref[...] = ((y - lse) + b_ref[...]).astype(o_ref.dtype)


def _normal_kernel(x_ref, w_ref, b_ref, o_ref):
    # Pure elementwise: identical code serves packed and unpacked layouts.
    o_ref[...] = (x_ref[...] * w_ref[...] + b_ref[...]).astype(o_ref.dtype)


def _get_kernel(mode, packed, seg_width):
    if mode == "normal":
        return _normal_kernel
    if packed:
        k = _additive_packed_kernel if mode == "additive" else _geometric_packed_kernel
        return functools.partial(k, seg_width=seg_width)
    return _additive_row_kernel if mode == "additive" else _geometric_row_kernel


_TRANSC_PER_ELEM = {"additive": 1, "geometric": 1, "normal": 0}
_FLOPS_PER_ELEM = {"additive": 6, "geometric": 6, "normal": 2}


# ------------------------------ wrapper ----------------------------------------

@functools.partial(jax.jit, static_argnames=("ensemble_mode", "tile_rows"))
def ensemble_layer_forward(x, weight, bias, *, ensemble_mode, tile_rows=None):
    """x: [B, C]; weight/bias: [1, C]; ensemble_mode in {additive,geometric,normal}."""
    B, C = x.shape
    itemsize = x.dtype.itemsize
    sublane = _sublane(itemsize)

    # Lane-dense packing when C < 128 divides 128 and B packs evenly.
    reps = 128 // C if (C < 128 and 128 % C == 0) else 1
    packed = reps > 1 and (B % reps == 0)
    if packed:
        rows, lane = B // reps, 128
        x_in = x.reshape(rows, lane)                 # free, contiguous reshape
        w_in = jnp.tile(weight, (1, reps))
        b_in = jnp.tile(bias, (1, reps))
    else:
        rows, lane = B, C
        x_in, w_in, b_in = x, weight, bias

    lane_pad = _round_up(lane, 128)
    if tile_rows is None:
        tile_rows = _choose_tile_rows(rows, lane_pad, itemsize, sublane)
    tile_rows = min(int(tile_rows), rows)
    if tile_rows != rows:                            # keep (sublane,128) divisibility
        tile_rows = min(max((tile_rows // sublane) * sublane, sublane), rows)
    grid = (pl.cdiv(rows, tile_rows),)

    # VMEM limit with lane/sublane padding accounted for (+ Mosaic slack).
    tile_pad = _round_up(tile_rows, sublane)
    vmem_data = 4 * tile_pad * lane_pad * itemsize       # x + out, double-buffered
    vmem_data += 4 * sublane * lane_pad * itemsize       # w + b resident blocks
    vmem_limit = int(min(_vmem_capacity(), max(vmem_data + (4 << 20), 8 << 20)))

    n = B * C
    cost = pl.CostEstimate(
        flops=_FLOPS_PER_ELEM[ensemble_mode] * n,
        transcendentals=_TRANSC_PER_ELEM[ensemble_mode] * n,
        bytes_accessed=(2 * n + 4 * C) * itemsize,
    )

    kernel = _get_kernel(ensemble_mode, packed, C)

    out = pl.pallas_call(
        kernel,
        out_shape=jax.ShapeDtypeStruct((rows, lane), x.dtype),
        grid=grid,
        in_specs=[
            pl.BlockSpec((tile_rows, lane), lambda i: (i, 0)),   # x: row-tiled
            pl.BlockSpec((1, lane), lambda i: (0, 0)),           # weight: resident
            pl.BlockSpec((1, lane), lambda i: (0, 0)),           # bias:   resident
        ],
        out_specs=pl.BlockSpec((tile_rows, lane), lambda i: (i, 0)),
        compiler_params=pltpu.CompilerParams(
            dimension_semantics=("parallel",),    # independent row blocks (megacore)
            vmem_limit_bytes=vmem_limit,
        ),
        cost_estimate=cost,
    )(x_in, w_in, b_in)

    return out.reshape(B, C) if packed else out


# ------------------------------ reference --------------------------------------

def ensemble_layer_ref(x, weight, bias, ensemble_mode):
    if ensemble_mode == "additive":
        y = x * jnp.exp(weight) + jnp.exp(bias)
        y = y / jnp.sum(y, axis=1, keepdims=True)
        return jnp.log(y + 1e-6)
    elif ensemble_mode == "geometric":
        y = x * jnp.exp(weight)
        return jax.nn.log_softmax(y, axis=-1) + bias
    elif ensemble_mode == "normal":
        return x * weight + bias


# ------------------------------ main --------------------------------------------

if __name__ == "__main__":
    key = jax.random.PRNGKey(0)
    kx, kw = jax.random.split(key)

    ok = True
    # (B, C, forced tile_rows):
    #   (8, 32, None): packed lane-dense path, single block
    #   (40, 32, 8)  : packed path, 2-step grid with a partial trailing block
    #   (16, 48, None): fallback [B, C] path (C does not divide 128), 2-step grid
    for (B, C, tile_rows) in ((8, 32, None), (40, 32, 8), (16, 48, None)):
        x = jax.nn.softmax(
            jax.random.normal(kx, (B, C), dtype=jnp.float32), axis=-1)
        weight = jax.random.normal(kw, (1, C), dtype=jnp.float32)
        bias = jnp.zeros((1, C), dtype=jnp.float32)

        for mode in ("additive", "geometric", "normal"):
            out = ensemble_layer_forward(
                x, weight, bias, ensemble_mode=mode, tile_rows=tile_rows)
            out = jax.block_until_ready(out)
            ref = ensemble_layer_ref(x, weight, bias, mode)
            if not jnp.allclose(out, ref, atol=1e-5, rtol=1e-5):
                ok = False
                print(f"mismatch B={B} C={C} tile_rows={tile_rows} mode={mode}: "
                      f"max err {float(jnp.max(jnp.abs(out - ref)))}")

    if ok:
        print("KERNEL_OK")
</pallas_src>

<mosaic_0001>
module attributes {stable_mosaic.version = 11 : i64} {
  func.func @_additive_packed_kernel(%arg0: i32, %arg1: memref<2x128xf32, #tpu.memory_space<vmem>>, %arg2: memref<1x128xf32, #tpu.memory_space<vmem>>, %arg3: memref<1x128xf32, #tpu.memory_space<vmem>>, %arg4: memref<2x128xf32, #tpu.memory_space<vmem>>) attributes {dimension_semantics = [#tpu.dimension_semantics<parallel>], iteration_bounds = array<i64: 1>, scalar_prefetch = 0 : i64, scratch_operands = 0 : i64, tpu.core_type = #tpu.core_type<tc>, window_params = [{transform_indices = @transform_0, window_bounds = array<i64: 2, 128>}, {pipeline_mode = #tpu.pipeline_mode<synchronous>, transform_indices = @transform_1, window_bounds = array<i64: 1, 128>}, {pipeline_mode = #tpu.pipeline_mode<synchronous>, transform_indices = @transform_2, window_bounds = array<i64: 1, 128>}, {transform_indices = @transform_3, window_bounds = array<i64: 2, 128>}]} {
    %c0 = arith.constant 0 : index
    %c0_0 = arith.constant 0 : index
    %0 = vector.load %arg1[%c0, %c0_0] : memref<2x128xf32, #tpu.memory_space<vmem>>, vector<2x128xf32>
    %c0_1 = arith.constant 0 : index
    %c0_2 = arith.constant 0 : index
    %1 = vector.load %arg2[%c0_1, %c0_2] : memref<1x128xf32, #tpu.memory_space<vmem>>, vector<1x128xf32>
    %2 = math.exp %1 : vector<1x128xf32>
    %3 = vector.broadcast %2 : vector<1x128xf32> to vector<2x128xf32>
    %4 = arith.mulf %0, %3 : vector<2x128xf32>
    %c0_3 = arith.constant 0 : index
    %c0_4 = arith.constant 0 : index
    %5 = vector.load %arg3[%c0_3, %c0_4] : memref<1x128xf32, #tpu.memory_space<vmem>>, vector<1x128xf32>
    %6 = math.exp %5 : vector<1x128xf32>
    %7 = vector.broadcast %6 : vector<1x128xf32> to vector<2x128xf32>
    %8 = arith.addf %4, %7 : vector<2x128xf32>
    %9 = tpu.iota {dimensions = array<i32: 1>} : vector<2x128xi32>
    %c127_i32 = arith.constant 127 : i32
    %10 = tpu.dynamic_rotate %8 by %c127_i32 dim 1 : vector<2x128xf32>, i32 -> vector<2x128xf32>
    %c1_i32 = arith.constant 1 : i32
    %11 = tpu.dynamic_rotate %8 by %c1_i32 dim 1 : vector<2x128xf32>, i32 -> vector<2x128xf32>
    %c1_i32_5 = arith.constant 1 : i32
    %12 = vector.broadcast %c1_i32_5 : i32 to vector<2x128xi32>
    %13 = arith.andi %9, %12 : vector<2x128xi32>
    %c0_i32 = arith.constant 0 : i32
    %14 = vector.broadcast %c0_i32 : i32 to vector<2x128xi32>
    %15 = arith.cmpi eq, %13, %14 : vector<2x128xi32>
    %16 = arith.select %15, %10, %11 : vector<2x128xi1>, vector<2x128xf32>
    %17 = arith.addf %8, %16 : vector<2x128xf32>
    %c126_i32 = arith.constant 126 : i32
    %18 = tpu.dynamic_rotate %17 by %c126_i32 dim 1 : vector<2x128xf32>, i32 -> vector<2x128xf32>
    %c2_i32 = arith.constant 2 : i32
    %19 = tpu.dynamic_rotate %17 by %c2_i32 dim 1 : vector<2x128xf32>, i32 -> vector<2x128xf32>
    %c2_i32_6 = arith.constant 2 : i32
    %20 = vector.broadcast %c2_i32_6 : i32 to vector<2x128xi32>
    %21 = arith.andi %9, %20 : vector<2x128xi32>
    %c0_i32_7 = arith.constant 0 : i32
    %22 = vector.broadcast %c0_i32_7 : i32 to vector<2x128xi32>
    %23 = arith.cmpi eq, %21, %22 : vector<2x128xi32>
    %24 = arith.select %23, %18, %19 : vector<2x128xi1>, vector<2x128xf32>
    %25 = arith.addf %17, %24 : vector<2x128xf32>
    %c124_i32 = arith.constant 124 : i32
    %26 = tpu.dynamic_rotate %25 by %c124_i32 dim 1 : vector<2x128xf32>, i32 -> vector<2x128xf32>
    %c4_i32 = arith.constant 4 : i32
    %27 = tpu.dynamic_rotate %25 by %c4_i32 dim 1 : vector<2x128xf32>, i32 -> vector<2x128xf32>
    %c4_i32_8 = arith.constant 4 : i32
    %28 = vector.broadcast %c4_i32_8 : i32 to vector<2x128xi32>
    %29 = arith.andi %9, %28 : vector<2x128xi32>
    %c0_i32_9 = arith.constant 0 : i32
    %30 = vector.broadcast %c0_i32_9 : i32 to vector<2x128xi32>
    %31 = arith.cmpi eq, %29, %30 : vector<2x128xi32>
    %32 = arith.select %31, %26, %27 : vector<2x128xi1>, vector<2x128xf32>
    %33 = arith.addf %25, %32 : vector<2x128xf32>
    %c120_i32 = arith.constant 120 : i32
    %34 = tpu.dynamic_rotate %33 by %c120_i32 dim 1 : vector<2x128xf32>, i32 -> vector<2x128xf32>
    %c8_i32 = arith.constant 8 : i32
    %35 = tpu.dynamic_rotate %33 by %c8_i32 dim 1 : vector<2x128xf32>, i32 -> vector<2x128xf32>
    %c8_i32_10 = arith.constant 8 : i32
    %36 = vector.broadcast %c8_i32_10 : i32 to vector<2x128xi32>
    %37 = arith.andi %9, %36 : vector<2x128xi32>
    %c0_i32_11 = arith.constant 0 : i32
    %38 = vector.broadcast %c0_i32_11 : i32 to vector<2x128xi32>
    %39 = arith.cmpi eq, %37, %38 : vector<2x128xi32>
    %40 = arith.select %39, %34, %35 : vector<2x128xi1>, vector<2x128xf32>
    %41 = arith.addf %33, %40 : vector<2x128xf32>
    %c112_i32 = arith.constant 112 : i32
    %42 = tpu.dynamic_rotate %41 by %c112_i32 dim 1 : vector<2x128xf32>, i32 -> vector<2x128xf32>
    %c16_i32 = arith.constant 16 : i32
    %43 = tpu.dynamic_rotate %41 by %c16_i32 dim 1 : vector<2x128xf32>, i32 -> vector<2x128xf32>
    %c16_i32_12 = arith.constant 16 : i32
    %44 = vector.broadcast %c16_i32_12 : i32 to vector<2x128xi32>
    %45 = arith.andi %9, %44 : vector<2x128xi32>
    %c0_i32_13 = arith.constant 0 : i32
    %46 = vector.broadcast %c0_i32_13 : i32 to vector<2x128xi32>
    %47 = arith.cmpi eq, %45, %46 : vector<2x128xi32>
    %48 = arith.select %47, %42, %43 : vector<2x128xi1>, vector<2x128xf32>
    %49 = arith.addf %41, %48 : vector<2x128xf32>
    %50 = tpu.reciprocal %49 : vector<2x128xf32> -> vector<2x128xf32>
    %51 = arith.mulf %8, %50 : vector<2x128xf32>
    %cst = arith.constant 9.99999997E-7 : f32
    %52 = vector.broadcast %cst : f32 to vector<2x128xf32>
    %53 = arith.addf %51, %52 : vector<2x128xf32>
    %54 = math.log %53 : vector<2x128xf32>
    %c0_14 = arith.constant 0 : index
    %c0_15 = arith.constant 0 : index
    %55 = vector.load %arg4[%c0_14, %c0_15] : memref<2x128xf32, #tpu.memory_space<vmem>>, vector<2x128xf32>
    tpu.vector_store %arg4[%c0_14, %c0_15], %54 {strides = array<i32>} : memref<2x128xf32, #tpu.memory_space<vmem>>, vector<2x128xf32>,
    return
  }
  func.func @transform_0(%arg0: i32) -> (i32, i32) {
    %c0_i32 = arith.constant 0 : i32
    %c0_i32_0 = arith.constant 0 : i32
    return %arg0, %c0_i32 : i32, i32
  }
  func.func @transform_1(%arg0: i32) -> (i32, i32) {
    %c0_i32 = arith.constant 0 : i32
    %c0_i32_0 = arith.constant 0 : i32
    %c0_i32_1 = arith.constant 0 : i32
    return %c0_i32, %c0_i32_0 : i32, i32
  }
  func.func @transform_2(%arg0: i32) -> (i32, i32) {
    %c0_i32 = arith.constant 0 : i32
    %c0_i32_0 = arith.constant 0 : i32
    %c0_i32_1 = arith.constant 0 : i32
    return %c0_i32, %c0_i32_0 : i32, i32
  }
  func.func @transform_3(%arg0: i32) -> (i32, i32) {
    %c0_i32 = arith.constant 0 : i32
    %c0_i32_0 = arith.constant 0 : i32
    return %arg0, %c0_i32 : i32, i32
  }
}

</mosaic_0001>

<bundles_post_ra>
// kernel: ensemble_layer_forward.1
= control target key start
LH: loop header
LB: loop body
LE: loop exit
PB: predicated region body
PF: predicated region fallthrough
CT: control target
= control target key end

     0   :  { %v19_v4 = vlaneseq  ;;  %s107_s18 = smov 126   ;;  %s108_s19 = smov 2   ;;  %s147_s1 = inlined_call_operand.vmem [shape: f32[1,128], index: 1, kind: input, shape index: {}]   ;;  %s148_s2 = inlined_call_operand.vmem [shape: f32[1,128], index: 2, kind: input, shape index: {}]   ;;  %s149_s0 = inlined_call_operand.vmem [shape: f32[2,128], index: 0, kind: input, shape index: {}]   ;;  %s150_s3 = inlined_call_operand.vmem [shape: f32[2,128], index: 3, kind: output, shape index: {}]  }
   0x1   :  { %v15_v0 = vld [vmem:[%s147_s1] sm:$0x1]  ;;  %s105_s1 = smov 127   ;;  %s110_s20 = smov 124  }
   0x2   :  { %v25_v1 = vld [vmem:[%s148_s2] sm:$0x1]  ;;  %v16_v2 = vmul.f32 1.442695, %v15_v0  ;;  %v20_v5 = vshrl.u32 %v19_v4, 7  ;;  %s106_s2 = smov 1  }
   0x3   :  { %v26_v3 = vmul.f32 1.442695, %v25_v1  ;;  %v14_v8 = vld [vmem:[%s149_s0] sm:$0x3]  ;;  %v36_v14 = vand.u32 127, %v19_v4  ;;  %s109_s0 = smov 4  }
   0x4   :  { %97 = vpow2.f32 %v16_v2  ;;  %v21_v6 = vsub.s32 0, %v20_v5  ;;  %s111_s21 = smov 8   ;;  %s112_s22 = smov 120  }
   0x5   :  { %99 = vpow2.f32 %v26_v3  ;;  %v41_v15 = vand.u32 1, %v36_v14  ;;  %v49_v20 = vand.u32 2, %v36_v14  ;;  %v57_v25 = vand.u32 4, %v36_v14  ;;  %s113_s23 = smov 16   ;;  %s114_s24 = smov 112  }
   0x6   :  { %v65_v30 = vand.u32 8, %v36_v14  ;;  %v73_v35 = vand.u32 16, %v36_v14 }
   0x7   :  { %vm42_vm0 = vcmp.eq.s32.totalorder %v41_v15, 0  ;;  %vm50_vm1 = vcmp.eq.s32.totalorder %v49_v20, 0  ;;  %vm58_vm2 = vcmp.eq.s32.totalorder %v57_v25, 0 }
   0x8   :  { %vm66_vm3 = vcmp.eq.s32.totalorder %v65_v30, 0  ;;  %vm74_vm4 = vcmp.eq.s32.totalorder %v73_v35, 0 }
   0xe   :  { %v98_v7 = vpop.eup %97 }
   0xf   :  { %v100_v9 = vpop.eup %99  ;;  %v22_v10 = vrot.slane %v98_v7, %v21_v6 }
  0x10   :  { %v32_v11 = vrot.slane %v100_v9, %v21_v6 }
  0x11   :  { %v24_v12 = vmul.f32 %v22_v10, %v14_v8 }
  0x13   :  { %v34_v13 = vadd.f32 %v32_v11, %v24_v12 }
  0x15   :  { %37 = vrot.lane.b32.xlu0 %v34_v13, %s105_s1 }
  0x19   :  { %39 = vrot.lane.b32.xlu0 %v34_v13, %s106_s2 }
  0x87   :  { %v38_v16 = vpop.permute.xlu0 %37 }
  0x8b   :  { %v40_v17 = vpop.permute.xlu0 %39 }
  0x8c   :  { %v43_v18 = vsel %vm42_vm0, %v38_v16, %v40_v17 }
  0x8d   :  { %v44_v19 = vadd.f32 %v43_v18, %v34_v13 }
  0x8f   :  { %45 = vrot.lane.b32.xlu1 %v44_v19, %s107_s18 }
  0x93   :  { %47 = vrot.lane.b32.xlu1 %v44_v19, %s108_s19 }
 0x101   :  { %v46_v21 = vpop.permute.xlu1 %45 }
 0x105   :  { %v48_v22 = vpop.permute.xlu1 %47 }
 0x106   :  { %v51_v23 = vsel %vm50_vm1, %v46_v21, %v48_v22 }
 0x107   :  { %v52_v24 = vadd.f32 %v51_v23, %v44_v19 }
 0x109   :  { %55 = vrot.lane.b32.xlu1 %v52_v24, %s109_s0  ;;  %53 = vrot.lane.b32.xlu0 %v52_v24, %s110_s20 }
 0x17b   :  { %v56_v26 = vpop.permute.xlu1 %55  ;;  %v54_v27 = vpop.permute.xlu0 %53 }
 0x17c   :  { %v59_v28 = vsel %vm58_vm2, %v54_v27, %v56_v26 }
 0x17d   :  { %v60_v29 = vadd.f32 %v59_v28, %v52_v24 }
 0x17f   :  { %63 = vrot.lane.b32.xlu1 %v60_v29, %s111_s21  ;;  %61 = vrot.lane.b32.xlu0 %v60_v29, %s112_s22 }
 0x1f1   :  { %v64_v31 = vpop.permute.xlu1 %63  ;;  %v62_v32 = vpop.permute.xlu0 %61 }
 0x1f2   :  { %v67_v33 = vsel %vm66_vm3, %v62_v32, %v64_v31 }
 0x1f3   :  { %v68_v34 = vadd.f32 %v67_v33, %v60_v29 }
 0x1f5   :  { %71 = vrot.lane.b32.xlu1 %v68_v34, %s113_s23  ;;  %69 = vrot.lane.b32.xlu0 %v68_v34, %s114_s24 }
 0x267   :  { %v72_v36 = vpop.permute.xlu1 %71  ;;  %v70_v37 = vpop.permute.xlu0 %69 }
 0x268   :  { %v75_v38 = vsel %vm74_vm4, %v70_v37, %v72_v36 }
 0x269   :  { %v76_v39 = vadd.f32 %v75_v38, %v68_v34 }
 0x26b   :  { %101 = vrcp.f32 %v76_v39 }
 0x275   :  { %v102_v40 = vpop.eup %101 }
 0x276   :  { %v78_v41 = vmul.f32 %v102_v40, %v34_v13 }
 0x278   :  { %v79_v42 = vadd.f32 1e-06, %v78_v41 }
 0x27a   :  { %103 = vlog2.f32 %v79_v42 }
 0x284   :  { %v104_v43 = vpop.eup %103 }
 0x285   :  { %v81_v44 = vmul.f32 0.6931472, %v104_v43 }
 0x287   :  { %82 = vst [vmem:[%s150_s3] sm:$0x3] %v81_v44 }

</bundles_post_ra>
